<compile_context>
chip_gen: v7x
topology: tpu7x:2x2x1
jax: 0.10.0
libtpu: 0.0.40
codegen_flags: <defaults>
</compile_context>

<pallas_src>
import functools

import jax
import jax.numpy as jnp
from jax import lax
from jax.experimental import pallas as pl
from jax.experimental.pallas import tpu as pltpu

IN_DIM = 9
OUT_DIM = 2
PAD = 16        # packed-weight padding (all fan-in/out dims <= 16)
CHUNK = 512     # in-kernel compute chunk along the batch/lane axis
LAYER_DIMS = [(9, 16), (16, 16), (16, 8), (8, 4), (4, 2)]   # (fan_in, fan_out)


def mlp_kernel(x_ref, w_ref, b_ref, o_ref, *, chunk):
    """Whole 5-layer MLP on one batch tile.

    x_ref : [tile, 9]      raw batch-major input rows (no host relayout)
    w_ref : [5, 16, 16]    packed zero-padded weights, layer k is [out, in]
    b_ref : [5, 16, 1]     packed zero-padded biases
    o_ref : [2, tile]      feature-major output (lane-dense along batch)
    """
    tile = x_ref.shape[0]
    n_chunks = tile // chunk

    # Load (near-)true-shape weights once; constant index_maps keep the packed
    # arrays VMEM-resident across grid steps. Zero padding keeps padded rows at
    # exactly 0 through bias+ReLU, so results are identical to the reference.
    w1 = w_ref[0, :, :IN_DIM]      # [16, 9]
    w2 = w_ref[1]                  # [16, 16]
    w3 = w_ref[2, :8, :]           # [8, 16]
    w4 = w_ref[3, :8, :8]          # [8, 8]  (rows 4..7 are zero padding)
    w5 = w_ref[4, :8, :8]          # [8, 8]  (rows 2..7 / cols 4..7 zero)
    b1 = b_ref[0]                  # [16, 1]
    b2 = b_ref[1]                  # [16, 1]
    b3 = b_ref[2, :8]              # [8, 1]
    b4 = b_ref[3, :8]              # [8, 1]
    b5 = b_ref[4, :8]              # [8, 1]

    # Static chunk loop with static slice offsets: keeps the whole 5-layer
    # chain register-resident per chunk (no VMEM spills of [16, tile] slabs).
    for c in range(n_chunks):
        off = c * chunk
        xc = x_ref[pl.ds(off, chunk), :]                       # [chunk, 9]
        # Layer 1: contract the size-9 feature axis -> feature-major [16, chunk].
        h = lax.dot_general(w1, xc, (((1,), (1,)), ((), ())),
                            preferred_element_type=jnp.float32) + b1
        h = jnp.maximum(h, 0.0)                                # [16, chunk]
        h = jnp.maximum(
            jnp.dot(w2, h, preferred_element_type=jnp.float32) + b2, 0.0)   # [16, chunk]
        h = jnp.maximum(
            jnp.dot(w3, h, preferred_element_type=jnp.float32) + b3, 0.0)   # [8, chunk]
        h = jnp.maximum(
            jnp.dot(w4, h, preferred_element_type=jnp.float32) + b4, 0.0)   # [8, chunk]
        out = jnp.dot(w5, h, preferred_element_type=jnp.float32) + b5       # [8, chunk]
        o_ref[:, pl.ds(off, chunk)] = out[:OUT_DIM, :].astype(o_ref.dtype)


def pack_params(params):
    """params: list of (W[out, in], b[out]) (PyTorch layout) -> packed padded arrays."""
    n_layers = len(params)
    w_pack = jnp.zeros((n_layers, PAD, PAD), jnp.float32)
    b_pack = jnp.zeros((n_layers, PAD, 1), jnp.float32)
    for k, (w, b) in enumerate(params):
        o, i = w.shape
        w_pack = w_pack.at[k, :o, :i].set(w.astype(jnp.float32))
        b_pack = b_pack.at[k, :o, 0].set(b.astype(jnp.float32))
    return w_pack, b_pack


def _round_up(n, m):
    return ((n + m - 1) // m) * m


def _choose_tile(n, tile_max):
    # Aim for >=4 grid steps when the batch allows (v7x 2-TC split + pipeline
    # overlap) while keeping each step's DMA big enough to amortize the
    # ~0.35us/step overhead. Cap keeps double-buffered VMEM well under limits
    # on every generation (v7x's 64 MiB included).
    t = _round_up(max(1, -(-n // 4)), 128)
    t = max(128, min(int(tile_max), t))
    if t > CHUNK:
        t = _round_up(t, CHUNK)   # so the in-kernel chunk loop divides evenly
    return t


@functools.partial(jax.jit, static_argnames=("tile_max",))
def simple_nn_forward(x, w_pack, b_pack, tile_max=8192):
    """x: [N, 9] -> [N, 2], same semantics as SimpleNNModel.forward."""
    n, f = x.shape
    n_layers = w_pack.shape[0]

    tile = _choose_tile(n, tile_max)
    chunk = min(CHUNK, tile)
    grid = (pl.cdiv(n, tile),)   # boundary blocks are masked by Pallas

    out_t = pl.pallas_call(
        functools.partial(mlp_kernel, chunk=chunk),
        out_shape=jax.ShapeDtypeStruct((OUT_DIM, n), jnp.float32),
        grid=grid,
        in_specs=[
            # x tiled along the batch axis; last dim 9 == full array dim.
            pl.BlockSpec((tile, f), lambda i: (i, 0)),
            # packed weights / biases: constant index_map -> VMEM-resident.
            pl.BlockSpec((n_layers, PAD, PAD), lambda i: (0, 0, 0)),
            pl.BlockSpec((n_layers, PAD, 1), lambda i: (0, 0, 0)),
        ],
        out_specs=pl.BlockSpec((OUT_DIM, tile), lambda i: (0, i)),
        compiler_params=pltpu.CompilerParams(
            dimension_semantics=("parallel",),   # megacore split on v7x
        ),
    )(x.astype(jnp.float32), w_pack, b_pack)

    # Tiny [2, N] -> [N, 2] transpose to match the caller's convention.
    return out_t.T


def init_params(key):
    """Deterministic PyTorch-style init: U(-1/sqrt(fan_in), 1/sqrt(fan_in))."""
    params = []
    for (fan_in, fan_out) in LAYER_DIMS:
        key, kw, kb = jax.random.split(key, 3)
        bound = 1.0 / jnp.sqrt(float(fan_in))
        w = jax.random.uniform(kw, (fan_out, fan_in), jnp.float32, -bound, bound)
        b = jax.random.uniform(kb, (fan_out,), jnp.float32, -bound, bound)
        params.append((w, b))
    return params


def reference_forward(x, params):
    h = x
    for i, (w, b) in enumerate(params):
        h = h @ w.T + b
        if i < len(params) - 1:
            h = jnp.maximum(h, 0.0)
    return h


if __name__ == "__main__":
    key = jax.random.PRNGKey(0)
    key, kx = jax.random.split(key)

    # Non-multiple of 128/tile to exercise boundary masking + a multi-step grid.
    batch = 1000
    x = jax.random.normal(kx, (batch, 9), jnp.float32)

    params = init_params(key)
    w_pack, b_pack = pack_params(params)

    out = simple_nn_forward(x, w_pack, b_pack)
    out = jax.block_until_ready(out)

    ref = reference_forward(x, params)
    assert out.shape == (batch, 2), out.shape
    assert jnp.allclose(out, ref, atol=1e-4, rtol=1e-4), (
        "mismatch vs reference, max abs err = "
        + str(float(jnp.max(jnp.abs(out - ref)))))

    print("KERNEL_OK")
</pallas_src>

<mosaic_0001>
module attributes {stable_mosaic.version = 11 : i64} {
  func.func @mlp_kernel(%arg0: i32, %arg1: memref<256x9xf32, #tpu.memory_space<vmem>>, %arg2: memref<5x16x16xf32, #tpu.memory_space<vmem>>, %arg3: memref<5x16x1xf32, #tpu.memory_space<vmem>>, %arg4: memref<2x256xf32, #tpu.memory_space<vmem>>) attributes {dimension_semantics = [#tpu.dimension_semantics<parallel>], iteration_bounds = array<i64: 4>, scalar_prefetch = 0 : i64, scratch_operands = 0 : i64, tpu.core_type = #tpu.core_type<tc>, window_params = [{transform_indices = @transform_0, window_bounds = array<i64: 256, 9>}, {pipeline_mode = #tpu.pipeline_mode<synchronous>, transform_indices = @transform_1, window_bounds = array<i64: 5, 16, 16>}, {pipeline_mode = #tpu.pipeline_mode<synchronous>, transform_indices = @transform_2, window_bounds = array<i64: 5, 16, 1>}, {transform_indices = @transform_3, window_bounds = array<i64: 2, 256>}]} {
    %c0 = arith.constant 0 : index
    %c0_0 = arith.constant 0 : index
    %c0_1 = arith.constant 0 : index
    %0 = vector.load %arg2[%c0, %c0_0, %c0_1] : memref<5x16x16xf32, #tpu.memory_space<vmem>>, vector<1x16x9xf32>
    %1 = vector.shape_cast %0 : vector<1x16x9xf32> to vector<16x9xf32>
    %c1 = arith.constant 1 : index
    %c0_2 = arith.constant 0 : index
    %c0_3 = arith.constant 0 : index
    %2 = vector.load %arg2[%c1, %c0_2, %c0_3] : memref<5x16x16xf32, #tpu.memory_space<vmem>>, vector<1x16x16xf32>
    %3 = vector.shape_cast %2 : vector<1x16x16xf32> to vector<16x16xf32>
    %c2 = arith.constant 2 : index
    %c0_4 = arith.constant 0 : index
    %c0_5 = arith.constant 0 : index
    %4 = vector.load %arg2[%c2, %c0_4, %c0_5] : memref<5x16x16xf32, #tpu.memory_space<vmem>>, vector<1x8x16xf32>
    %5 = vector.shape_cast %4 : vector<1x8x16xf32> to vector<8x16xf32>
    %c3 = arith.constant 3 : index
    %c0_6 = arith.constant 0 : index
    %c0_7 = arith.constant 0 : index
    %6 = vector.load %arg2[%c3, %c0_6, %c0_7] : memref<5x16x16xf32, #tpu.memory_space<vmem>>, vector<1x8x8xf32>
    %7 = vector.shape_cast %6 : vector<1x8x8xf32> to vector<8x8xf32>
    %c4 = arith.constant 4 : index
    %c0_8 = arith.constant 0 : index
    %c0_9 = arith.constant 0 : index
    %8 = vector.load %arg2[%c4, %c0_8, %c0_9] : memref<5x16x16xf32, #tpu.memory_space<vmem>>, vector<1x8x8xf32>
    %9 = vector.shape_cast %8 : vector<1x8x8xf32> to vector<8x8xf32>
    %c0_10 = arith.constant 0 : index
    %c0_11 = arith.constant 0 : index
    %c0_12 = arith.constant 0 : index
    %10 = vector.load %arg3[%c0_10, %c0_11, %c0_12] : memref<5x16x1xf32, #tpu.memory_space<vmem>>, vector<1x16x1xf32>
    %11 = vector.shape_cast %10 : vector<1x16x1xf32> to vector<16x1xf32>
    %c1_13 = arith.constant 1 : index
    %c0_14 = arith.constant 0 : index
    %c0_15 = arith.constant 0 : index
    %12 = vector.load %arg3[%c1_13, %c0_14, %c0_15] : memref<5x16x1xf32, #tpu.memory_space<vmem>>, vector<1x16x1xf32>
    %13 = vector.shape_cast %12 : vector<1x16x1xf32> to vector<16x1xf32>
    %c2_16 = arith.constant 2 : index
    %c0_17 = arith.constant 0 : index
    %c0_18 = arith.constant 0 : index
    %14 = vector.load %arg3[%c2_16, %c0_17, %c0_18] : memref<5x16x1xf32, #tpu.memory_space<vmem>>, vector<1x8x1xf32>
    %15 = vector.shape_cast %14 : vector<1x8x1xf32> to vector<8x1xf32>
    %c3_19 = arith.constant 3 : index
    %c0_20 = arith.constant 0 : index
    %c0_21 = arith.constant 0 : index
    %16 = vector.load %arg3[%c3_19, %c0_20, %c0_21] : memref<5x16x1xf32, #tpu.memory_space<vmem>>, vector<1x8x1xf32>
    %17 = vector.shape_cast %16 : vector<1x8x1xf32> to vector<8x1xf32>
    %c4_22 = arith.constant 4 : index
    %c0_23 = arith.constant 0 : index
    %c0_24 = arith.constant 0 : index
    %18 = vector.load %arg3[%c4_22, %c0_23, %c0_24] : memref<5x16x1xf32, #tpu.memory_space<vmem>>, vector<1x8x1xf32>
    %19 = vector.shape_cast %18 : vector<1x8x1xf32> to vector<8x1xf32>
    %c0_25 = arith.constant 0 : index
    %c0_26 = arith.constant 0 : index
    %20 = vector.load %arg1[%c0_25, %c0_26] : memref<256x9xf32, #tpu.memory_space<vmem>>, vector<256x9xf32>
    %cst = arith.constant dense<0.000000e+00> : vector<16x256xf32>
    %21 = tpu.matmul %1, %20, %cst {dimension_numbers = #tpu.dot_dimension_numbers<[1], [1], [0], [0], [0, 0, 1, 0], [], []>} : vector<16x9xf32>, vector<256x9xf32>, vector<16x256xf32> -> vector<16x256xf32>
    %22 = vector.broadcast %11 : vector<16x1xf32> to vector<16x256xf32>
    %23 = arith.addf %21, %22 : vector<16x256xf32>
    %cst_27 = arith.constant 0.000000e+00 : f32
    %24 = vector.broadcast %cst_27 : f32 to vector<16x256xf32>
    %25 = arith.maximumf %23, %24 : vector<16x256xf32>
    %cst_28 = arith.constant dense<0.000000e+00> : vector<16x256xf32>
    %26 = tpu.matmul %3, %25, %cst_28 {dimension_numbers = #tpu.dot_dimension_numbers<[1], [0], [0], [1], [0, 0, 1, 1], [], []>} : vector<16x16xf32>, vector<16x256xf32>, vector<16x256xf32> -> vector<16x256xf32>
    %27 = vector.broadcast %13 : vector<16x1xf32> to vector<16x256xf32>
    %28 = arith.addf %26, %27 : vector<16x256xf32>
    %cst_29 = arith.constant 0.000000e+00 : f32
    %29 = vector.broadcast %cst_29 : f32 to vector<16x256xf32>
    %30 = arith.maximumf %28, %29 : vector<16x256xf32>
    %cst_30 = arith.constant dense<0.000000e+00> : vector<8x256xf32>
    %31 = tpu.matmul %5, %30, %cst_30 {dimension_numbers = #tpu.dot_dimension_numbers<[1], [0], [0], [1], [0, 0, 1, 1], [], []>} : vector<8x16xf32>, vector<16x256xf32>, vector<8x256xf32> -> vector<8x256xf32>
    %32 = vector.broadcast %15 : vector<8x1xf32> to vector<8x256xf32>
    %33 = arith.addf %31, %32 : vector<8x256xf32>
    %cst_31 = arith.constant 0.000000e+00 : f32
    %34 = vector.broadcast %cst_31 : f32 to vector<8x256xf32>
    %35 = arith.maximumf %33, %34 : vector<8x256xf32>
    %cst_32 = arith.constant dense<0.000000e+00> : vector<8x256xf32>
    %36 = tpu.matmul %7, %35, %cst_32 {dimension_numbers = #tpu.dot_dimension_numbers<[1], [0], [0], [1], [0, 0, 1, 1], [], []>} : vector<8x8xf32>, vector<8x256xf32>, vector<8x256xf32> -> vector<8x256xf32>
    %37 = vector.broadcast %17 : vector<8x1xf32> to vector<8x256xf32>
    %38 = arith.addf %36, %37 : vector<8x256xf32>
    %cst_33 = arith.constant 0.000000e+00 : f32
    %39 = vector.broadcast %cst_33 : f32 to vector<8x256xf32>
    %40 = arith.maximumf %38, %39 : vector<8x256xf32>
    %cst_34 = arith.constant dense<0.000000e+00> : vector<8x256xf32>
    %41 = tpu.matmul %9, %40, %cst_34 {dimension_numbers = #tpu.dot_dimension_numbers<[1], [0], [0], [1], [0, 0, 1, 1], [], []>} : vector<8x8xf32>, vector<8x256xf32>, vector<8x256xf32> -> vector<8x256xf32>
    %42 = vector.broadcast %19 : vector<8x1xf32> to vector<8x256xf32>
    %43 = arith.addf %41, %42 : vector<8x256xf32>
    %44 = vector.extract_strided_slice %43 {offsets = [0, 0], sizes = [2, 256], strides = [1, 1]} : vector<8x256xf32> to vector<2x256xf32>
    %c0_35 = arith.constant 0 : index
    %c0_36 = arith.constant 0 : index
    %45 = vector.load %arg4[%c0_35, %c0_36] : memref<2x256xf32, #tpu.memory_space<vmem>>, vector<2x256xf32>
    tpu.vector_store %arg4[%c0_35, %c0_36], %44 {strides = array<i32>} : memref<2x256xf32, #tpu.memory_space<vmem>>, vector<2x256xf32>,
    return
  }
  func.func @transform_0(%arg0: i32) -> (i32, i32) {
    %c0_i32 = arith.constant 0 : i32
    %c0_i32_0 = arith.constant 0 : i32
    return %arg0, %c0_i32 : i32, i32
  }
  func.func @transform_1(%arg0: i32) -> (i32, i32, i32) {
    %c0_i32 = arith.constant 0 : i32
    %c0_i32_0 = arith.constant 0 : i32
    %c0_i32_1 = arith.constant 0 : i32
    %c0_i32_2 = arith.constant 0 : i32
    return %c0_i32, %c0_i32_0, %c0_i32_1 : i32, i32, i32
  }
  func.func @transform_2(%arg0: i32) -> (i32, i32, i32) {
    %c0_i32 = arith.constant 0 : i32
    %c0_i32_0 = arith.constant 0 : i32
    %c0_i32_1 = arith.constant 0 : i32
    %c0_i32_2 = arith.constant 0 : i32
    return %c0_i32, %c0_i32_0, %c0_i32_1 : i32, i32, i32
  }
  func.func @transform_3(%arg0: i32) -> (i32, i32) {
    %c0_i32 = arith.constant 0 : i32
    %c0_i32_0 = arith.constant 0 : i32
    return %c0_i32, %arg0 : i32, i32
  }
}

</mosaic_0001>

<bundles_post_ra>
// kernel: simple_nn_forward.1
= control target key start
LH: loop header
LB: loop body
LE: loop exit
PB: predicated region body
PF: predicated region fallthrough
CT: control target
= control target key end

     0   :  { %8 = vsyncpa [#allocation3], 0  ;;  %s1380_s0 = inlined_call_operand.vmem [shape: f32[1000,9], index: 0, kind: input, shape index: {}]   ;;  %s1381_s1 = inlined_call_operand.vmem [shape: f32[5,16,16], index: 1, kind: input, shape index: {}]   ;;  %s1382_s2 = inlined_call_operand.vmem [shape: f32[5,16,1], index: 2, kind: input, shape index: {}]   ;;  %s1383_s3 = inlined_call_operand.hbm [shape: f32[2,1000], index: 3, kind: output, shape index: {}]  }
   0x1   :  { %10 = vsyncpa [#allocation3 + $0x1], 0  ;;  %s1151_s12 = smov 0   ;;  %s1153_s13 = smov 0  }
   0x2   :  { %s1155_s14 = smov 0   ;;  %s1157_s15 = smov 0  }
   0x3 LB: > { %s1172_s16 = sadd.s32 4294967295, %s1126_s15   ;;  %s866_s17 = sadd.s32 4294967294, %s1126_s15   ;;  %s1126_s15 = sphi %s1157_s15, %s1391_s15   ;;  %s1122_s14 = sphi %s1155_s14, %s1390_s14   ;;  %s1118_s13 = sphi %s1153_s13, %s1389_s13   ;;  %s1114_s12 = sphi %s1151_s12, %s1388_s12  }
   0x4   : > { %s1176_s18 = sadd.s32 1, %s1126_s15   ;;  %s91_s19 = sadd.s32 1, %s1122_s14 }
   0x5   : > { %s88_s20 = ssub.s32 %s1126_s15, %s1176_s18  ;;  %p101_p0 = scmp.ne.s32.totalorder %s1122_s14, %s1118_s13 }
   0x6   : > { %p89_p1 = scmp.eq.s32.totalorder %s88_s20, 0  ;;  %p102_p2 = scmp.eq.s32.totalorder %s1172_s16, 3 }
   0x7   : > { %p107_p3 = scmp.ne.s32.totalorder %s1118_s13, %s1114_s12  ;;  %p108_p4 = scmp.eq.s32.totalorder %s866_s17, 3 }
   0x8   : > { %s1187_s21 = scalar_select %p89_p1, %s1122_s14, %s91_s19  }
   0x9   : > { %p1189_p5 = por %p102_p2, %p101_p0  ;;  %p1193_p6 = por %p108_p4, %p107_p3 }
   0xa   : > { %p869_p7 = scmp.ge.s32.totalorder %s1126_s15, 1  ;;  %p149_p8 = scmp.lt.s32.totalorder %s1126_s15, 5 }
   0xc   : > { %p150_p9 = pnand %p869_p7, %p149_p8 }
   0xd   : > { %s871_s24 = sshll.u32 (!%p150_p9), %s1172_s16, 5  ;;  %vm256_vm0 = vcmask (!%p150_p9), 72704   ;;  %v1203_v0 = vld [vmem:[%s1381_s1] sm:$0xff] (!%p150_p9)  ;;  %v1128_v2 = vmov (!%p150_p9), 0   ;;  %v204_v3 = vld [vmem:[%s1382_s2 + $0x8] sm:$0xff] (!%p150_p9)  ;;  %v1129_v56 = vmov (!%p150_p9), 0.0  }
   0xe   : > { %153 = sbr.rel (%p150_p9) target bundleno = 1214 (0x4be), region = 32  ;;  %v203_v1 = vld [vmem:[%s1382_s2] sm:$0xff] (!%p150_p9)  ;;  %p182_p10 = scmp.lt.s32.totalorder (!%p150_p9), %s871_s24, 124  ;;  %961 = vmatprep.mubr.msk.f32.mxu0 (!%p150_p9), %vm256_vm0, %v1203_v0  ;;  %1062 = vset.pattern.permute.xlu0 (!%p150_p9), %v1128_v2  ;;  %vm1220_vm1 = vmpackc.low (!%p150_p9), %vm256_vm0, %vm256_vm0  ;;  %v193_v55 = vld [vmem:[%s1381_s1 + $0x8] sm:$0xff] (!%p150_p9)  ;;  %vm450_vm2 = vcmask (!%p150_p9), 130048   ;;  %vm624_vm3 = vcmask (!%p150_p9), 64512  }
   0xf   : > { %248 = vperm.xlu0 (!%p150_p9), %1062, %v203_v1   ;;  %1063 = vset.pattern.permute.xlu1 (!%p150_p9), %v1128_v2  ;;  %v880_v5 = vld [vmem:[%s1382_s2 + $0x20] sm:$0xff] (!%p150_p9)  ;;  %v878_v57 = vld [vmem:[%s1382_s2 + $0x10] sm:$0xff] (!%p150_p9)  ;;  %v879_v58 = vld [vmem:[%s1382_s2 + $0x18] sm:$0xff] (!%p150_p9)  ;;  %s174_s17 = sand.u32 (!%p150_p9), 1, %s1118_s13   ;;  %s928_s20 = sshll.u32 (!%p150_p9), %s1172_s16, 6 }
  0x10   : > { %v882_v15 = vld [vmem:[%s1382_s2 + $0x40] sm:$0xff] (!%p150_p9)  ;;  %521 = vmatprep.mubr.f32.mxu1 (!%p150_p9), %v1129_v56  ;;  %442 = vperm.xlu1 (!%p150_p9), %1063, %v878_v57   ;;  %v881_v59 = vld [vmem:[%s1382_s2 + $0x30] sm:$0xff] (!%p150_p9)  ;;  %s870_s19 = sshll.u32 (!%p150_p9), %s174_s17, 2  ;;  %s1338_s28 = scalar_lea.hbm (!%p150_p9), %s1383_s3, %s928_s20 }
  0x11   : > { %s793_s29 = scalar_lea.sflag (!%p150_p9), [#allocation3], %s174_s17  ;;  %s1130_s16 = smov (!%p150_p9), [#allocation2]  }
  0x13   : > { %253 = vperm.xlu0 (!%p150_p9), %1062, %v204_v3  }
  0x14   : > { %447 = vperm.xlu1 (!%p150_p9), %1063, %v879_v58  }
  0x15   : > { %s1393_s24 = smov (!%p182_p10, %s871_s24), 124 }
  0x16   : > { %s872_s4 = sshll.u32 %s1393_s24, 3  ;;  %s176_s24 = scalar_lea.vmem [#allocation2], %s870_s19 }
  0x17   : > { %s1216_s7 = scalar_lea.vmem %s1380_s0, %s872_s4  ;;  %540 = vperm.xlu0 %1062, %v880_v5   ;;  %s807_s25 = sshll.u32 %s176_s24, 4  ;;  %s1340_s25 = int_to_ptr.vmem [resolvable:$true] %s807_s25 }
  0x18   : > { %v230_v6 = vld [vmem:[%s1216_s7 + $0x80] sm:$0xff]  ;;  %v231_v7 = vld [vmem:[%s1216_s7 + $0x88] sm:$0xff]  ;;  %v232_v11 = vld [vmem:[%s1216_s7 + $0x90] sm:$0xff]  ;;  %621 = vperm.xlu1 %1063, %v881_v59   ;;  %s1064_s30 = scalar_lea.vmem %s1340_s25, 64  ;;  %s1068_s4 = sshll.u32 %s1130_s16, 4  ;;  %s1069_s4 = int_to_ptr.vmem [resolvable:$false] %s1068_s4 }
  0x19   : > { %v214_v8 = vld [vmem:[%s1216_s7] sm:$0xff]  ;;  %v965_v9 = vpack.c.bf16 %v231_v7, %v230_v6  ;;  %v215_v10 = vld [vmem:[%s1216_s7 + $0x8] sm:$0xff]  ;;  %v233_v12 = vld [vmem:[%s1216_s7 + $0x98] sm:$0xff]  ;;  %p1065_p11 = scmp.ne.s32.totalorder %s1340_s25, %s1064_s30  ;;  %s1070_s5 = scalar_lea.vmem %s1069_s4, 128 }
  0x1a   : > { %v968_v13 = vpack.c.bf16 %v215_v10, %v214_v8  ;;  %v971_v14 = vpack.c.bf16 %v233_v12, %v232_v11  ;;  %v216_v16 = vld [vmem:[%s1216_s7 + $0x10] sm:$0xff]  ;;  %v217_v17 = vld [vmem:[%s1216_s7 + $0x18] sm:$0xff]  ;;  %v234_v18 = vld [vmem:[%s1216_s7 + $0xa0] sm:$0xff]  ;;  %p1071_p0 = scmp.lt.s32.totalorder %s1340_s25, %s1069_s4  ;;  %p1072_p1 = scmp.lt.s32.totalorder %s1070_s5, %s1064_s30 }
  0x1b   : > { %967 = vmatprep.subr.msk.bf16.mxu0 %vm1220_vm1, %v965_v9  ;;  %v235_v19 = vld [vmem:[%s1216_s7 + $0xa8] sm:$0xff]  ;;  %703 = vperm.xlu0 %1062, %v882_v15   ;;  %v974_v20 = vpack.c.bf16 %v217_v17, %v216_v16  ;;  %v218_v22 = vld [vmem:[%s1216_s7 + $0x20] sm:$0xff]  ;;  %v236_v24 = vld [vmem:[%s1216_s7 + $0xb0] sm:$0xff]  ;;  %p1066_p12 = pnand %p1065_p11, %p1189_p5 }
  0x1c   : > { %970 = vmatpush3.bf16.xpose.msk.msra.mxu0 %vm1220_vm1, %v968_v13  ;;  %v977_v21 = vpack.c.bf16 %v235_v19, %v234_v18  ;;  %v219_v23 = vld [vmem:[%s1216_s7 + $0x28] sm:$0xff]  ;;  %v237_v25 = vld [vmem:[%s1216_s7 + $0xb8] sm:$0xff]  ;;  %v220_v28 = vld [vmem:[%s1216_s7 + $0x30] sm:$0xff]  ;;  %p1073_p2 = por %p1072_p1, %p1071_p0 }
  0x1d   : > { %973 = vmatprep.subr.msk.bf16.mxu0 %vm1220_vm1, %v971_v14  ;;  %v980_v26 = vpack.c.bf16 %v219_v23, %v218_v22  ;;  %v983_v27 = vpack.c.bf16 %v237_v25, %v236_v24  ;;  %v221_v29 = vld [vmem:[%s1216_s7 + $0x38] sm:$0xff]  ;;  %v238_v30 = vld [vmem:[%s1216_s7 + $0xc0] sm:$0xff]  ;;  %v239_v31 = vld [vmem:[%s1216_s7 + $0xc8] sm:$0xff]  ;;  %p1067_p13 = pneg %p1066_p12 }
  0x1e   : > { %v986_v32 = vpack.c.bf16 %v221_v29, %v220_v28  ;;  %v989_v33 = vpack.c.bf16 %v239_v31, %v238_v30  ;;  %v222_v34 = vld [vmem:[%s1216_s7 + $0x40] sm:$0xff]  ;;  %v223_v35 = vld [vmem:[%s1216_s7 + $0x48] sm:$0xff]  ;;  %v240_v36 = vld [vmem:[%s1216_s7 + $0xd0] sm:$0xff] }
  0x1f   : > { %v241_v37 = vld [vmem:[%s1216_s7 + $0xd8] sm:$0xff]  ;;  %v992_v38 = vpack.c.bf16 %v223_v35, %v222_v34  ;;  %v224_v40 = vld [vmem:[%s1216_s7 + $0x50] sm:$0xff]  ;;  %v242_v42 = vld [vmem:[%s1216_s7 + $0xe0] sm:$0xff]  ;;  %p1074_p3 = pnand %p1073_p2, %p1067_p13 }
  0x20   : > { %v995_v39 = vpack.c.bf16 %v241_v37, %v240_v36  ;;  %v225_v41 = vld [vmem:[%s1216_s7 + $0x58] sm:$0xff]  ;;  %v243_v43 = vld [vmem:[%s1216_s7 + $0xe8] sm:$0xff]  ;;  %v226_v46 = vld [vmem:[%s1216_s7 + $0x60] sm:$0xff] }
  0x21   : > { %v998_v44 = vpack.c.bf16 %v225_v41, %v224_v40  ;;  %v1001_v45 = vpack.c.bf16 %v243_v43, %v242_v42  ;;  %v227_v47 = vld [vmem:[%s1216_s7 + $0x68] sm:$0xff]  ;;  %v244_v48 = vld [vmem:[%s1216_s7 + $0xf0] sm:$0xff]  ;;  %v245_v49 = vld [vmem:[%s1216_s7 + $0xf8] sm:$0xff] }
  0x22   : > { %v1004_v50 = vpack.c.bf16 %v227_v47, %v226_v46  ;;  %v1007_v51 = vpack.c.bf16 %v245_v49, %v244_v48  ;;  %v228_v52 = vld [vmem:[%s1216_s7 + $0x70] sm:$0xff]  ;;  %v229_v53 = vld [vmem:[%s1216_s7 + $0x78] sm:$0xff]  ;;  %v875_v30 = vld [vmem:[%s1381_s1 + $0x20] sm:$0xff] }
  0x23   : > { %v1010_v54 = vpack.c.bf16 %v229_v53, %v228_v52  ;;  %v873_v12 = vld [vmem:[%s1381_s1 + $0x10] sm:$0xff]  ;;  %v874_v13 = vld [vmem:[%s1381_s1 + $0x18] sm:$0xff]  ;;  %v877_v46 = vld [vmem:[%s1381_s1 + $0x40] sm:$0xff] }
  0x24   : > { %976 = vmatpush3.bf16.xpose.msk.msra.mxu0 %vm1220_vm1, %v974_v20 }
  0x25   : > { %979 = vmatprep.subr.msk.bf16.mxu0 %vm1220_vm1, %v977_v21 }
  0x2c   : > { %982 = vmatpush3.bf16.xpose.msk.msra.mxu0 %vm1220_vm1, %v980_v26 }
  0x2d   : > { %985 = vmatprep.subr.msk.bf16.mxu0 %vm1220_vm1, %v983_v27 }
  0x34   : > { %988 = vmatpush3.bf16.xpose.msk.msra.mxu0 %vm1220_vm1, %v986_v32 }
  0x35   : > { %991 = vmatprep.subr.msk.bf16.mxu0 %vm1220_vm1, %v989_v33 }
  0x3c   : > { %994 = vmatpush3.bf16.xpose.msk.msra.mxu0 %vm1220_vm1, %v992_v38  ;;  %v876_v38 = vld [vmem:[%s1381_s1 + $0x30] sm:$0xff] }
  0x3d   : > { %997 = vmatprep.subr.msk.bf16.mxu0 %vm1220_vm1, %v995_v39 }
  0x44   : > { %1000 = vmatpush3.bf16.xpose.msk.msra.mxu0 %vm1220_vm1, %v998_v44 }
  0x45   : > { %1003 = vmatprep.subr.msk.bf16.mxu0 %vm1220_vm1, %v1001_v45 }
  0x4c   : > { %1006 = vmatpush3.bf16.xpose.msk.msra.mxu0 %vm1220_vm1, %v1004_v50 }
  0x4d   : > { %1009 = vmatprep.subr.msk.bf16.mxu0 %vm1220_vm1, %v1007_v51 }
  0x54   : > { %1012 = vmatpush3.bf16.xpose.msk.msra.mxu0 %vm1220_vm1, %v1010_v54 }
  0x5b   : > { %962 = vmatmul.mubr.msk.f32.vlgmr.msra.gmra.mrb[0].mxu0 %vm256_vm0, %v1203_v0 }
  0x5c   : > { %963 = vmatprep.mubr.msk.f32.mxu0 %vm256_vm0, %v193_v55 }
  0x5f   : > { %964 = vmatmul.mubr.msk.f32.gmra.mrb[2].mxu0 %vm256_vm0, %v193_v55 }
  0x8e   : > { %v249_v60 = vpop.permute.xlu0 %248 }
  0x8f   : > { %v443_v14 = vpop.permute.xlu1 %442 }
  0x92   : > { %v254_v0 = vpop.permute.xlu0 %253 }
  0x93   : > { %v448_v18 = vpop.permute.xlu1 %447 }
  0x96   : > { %v541_v31 = vpop.permute.xlu0 %540 }
  0x97   : > { %v622_v39 = vpop.permute.xlu1 %621 }
  0x9a   : > { %v704_v47 = vpop.permute.xlu0 %703 }
 0x12e   : > { %v425_v61 = vpop.f32.mrb[0].mxu0 }
 0x12f   : > { %v427_v62 = vpop.f32.mrb[1].mxu0  ;;  %v426_v63 = vadd.f32 %v425_v61, %v249_v60 }
 0x130   : > { %v428_v1 = vadd.f32 %v427_v62, %v249_v60 }
 0x131   : > { %v436_v6 = vmax.f32 %v426_v63, 0.0 }
 0x132   : > { %v431_v2 = vpop.f32.mrb[2].mxu0  ;;  %v437_v8 = vmax.f32 %v428_v1, 0.0 }
 0x133   : > { %v432_v3 = vadd.f32 %v431_v2, %v254_v0  ;;  %v433_v4 = vpop.f32.mrb[3].mxu0 }
 0x134   : > { %v434_v5 = vadd.f32 %v433_v4, %v254_v0 }
 0x135   : > { %v438_v7 = vmax.f32 %v432_v3, 0.0 }
 0x136   : > { %v439_v9 = vmax.f32 %v434_v5, 0.0 }
 0x137   : > { %v1015_v10 = vpack.c.bf16 %v438_v7, %v436_v6 }
 0x138   : > { %v1013_v11 = vpack.c.bf16 %v439_v9, %v437_v8 }
 0x13a   : > { %1014 = vmatprep.subr.bf16.mxu1 %v1013_v11 }
 0x13b   : > { %1016 = vmatpush1.bf16.msra.mxu1 %v1015_v10 }
 0x13e   : > { %917 = vmatmul.mubr.msk.f32.vlgmr.msra.gmra.mrb[0].mxu1 %vm450_vm2, %v873_v12 }
 0x13f   : > { %527 = vmatprep.mubr.f32.mxu1 %v1129_v56 }
 0x142   : > { %918 = vmatmul.mubr.msk.f32.gmra.mrb[2].mxu1 %vm450_vm2, %v874_v13 }
 0x143   : > { %610 = vmatprep.mubr.f32.mxu1 %v1129_v56 }
 0x211   : > { %v523_v15 = vpop.f32.mrb[0].mxu1 }
 0x212   : > { %v525_v16 = vpop.f32.mrb[1].mxu1  ;;  %v524_v17 = vadd.f32 %v523_v15, %v443_v14 }
 0x213   : > { %v526_v19 = vadd.f32 %v525_v16, %v443_v14 }
 0x214   : > { %v534_v24 = vmax.f32 %v524_v17, 0.0 }
 0x215   : > { %v529_v20 = vpop.f32.mrb[2].mxu1  ;;  %v535_v26 = vmax.f32 %v526_v19, 0.0 }
 0x216   : > { %v530_v21 = vadd.f32 %v529_v20, %v448_v18  ;;  %v531_v22 = vpop.f32.mrb[3].mxu1 }
 0x217   : > { %v532_v23 = vadd.f32 %v531_v22, %v448_v18 }
 0x218   : > { %v536_v25 = vmax.f32 %v530_v21, 0.0 }
 0x219   : > { %v537_v27 = vmax.f32 %v532_v23, 0.0 }
 0x21a   : > { %v1019_v28 = vpack.c.bf16 %v536_v25, %v534_v24 }
 0x21b   : > { %v1017_v29 = vpack.c.bf16 %v537_v27, %v535_v26 }
 0x21d   : > { %1018 = vmatprep.subr.bf16.mxu1 %v1017_v29 }
 0x21e   : > { %1020 = vmatpush1.bf16.msra.mxu1 %v1019_v28 }
 0x221   : > { %919 = vmatmul.mubr.msk.f32.vlgmr.msra.gmra.mrb[4].mxu1 %vm450_vm2, %v875_v30 }
 0x222   : > { %692 = vmatprep.mubr.f32.mxu1 %v1129_v56 }
 0x2f4   : > { %v612_v32 = vpop.f32.mrb[4].mxu1 }
 0x2f5   : > { %v613_v33 = vadd.f32 %v612_v32, %v541_v31  ;;  %v614_v34 = vpop.f32.mrb[5].mxu1 }
 0x2f6   : > { %v615_v35 = vadd.f32 %v614_v34, %v541_v31 }
 0x2f7   : > { %v617_v37 = vmax.f32 %v613_v33, 0.0 }
 0x2f8   : > { %v618_v36 = vmax.f32 %v615_v35, 0.0 }
 0x2fa   : > { %628 = vmatprep.subr.mxu1 %v618_v36 }
 0x2fb   : > { %629 = vmatpush1.msra.mxu1 %v617_v37 }
 0x2fc   : > { %920 = vmatmul.mubr.msk.f32.vlgmr.msra.gmra.mrb[6].mxu1 %vm624_vm3, %v876_v38 }
 0x2fd   : > { %773 = vmatprep.mubr.f32.mxu1 %v1129_v56 }
 0x3cf   : > { %v694_v40 = vpop.f32.mrb[6].mxu1 }
 0x3d0   : > { %v695_v41 = vadd.f32 %v694_v40, %v622_v39  ;;  %v696_v42 = vpop.f32.mrb[7].mxu1 }
 0x3d1   : > { %v697_v43 = vadd.f32 %v696_v42, %v622_v39 }
 0x3d2   : > { %v699_v45 = vmax.f32 %v695_v41, 0.0 }
 0x3d3   : > { %v700_v44 = vmax.f32 %v697_v43, 0.0 }
 0x3d5   : > { %709 = vmatprep.subr.mxu1 %v700_v44 }
 0x3d6   : > { %710 = vmatpush1.msra.mxu1 %v699_v45 }
 0x3d7   : > { %921 = vmatmul.mubr.msk.f32.vlgmr.msra.gmra.mrb[8].mxu1 %vm624_vm3, %v877_v46 }
 0x4aa   : > { %v775_v48 = vpop.f32.mrb[8].mxu1 }
 0x4ab   : > { %v776_v49 = vadd.f32 %v775_v48, %v704_v47  ;;  %v777_v50 = vpop.f32.mrb[9].mxu1 }
 0x4ac   : > { %v778_v51 = vadd.f32 %v777_v50, %v704_v47 }
 0x4ae   : > { %v782_v52 = vcombine.low %v776_v49, %v778_v51 }
 0x4b0   : > { %922 = vst.sshfl [vmem:[%s176_s24] sm:$0x33 pattern:$0x76325410] %v782_v52 }
 0x4b1   : > { %1077 = shalt.err (!%p1074_p3)
}
 0x4b2   : > { %s1078_s6 = scalar_lea.hbm %s1338_s28, 64  ;;  %s1082_s9 = scalar_lea.hbm %s1383_s3, 256 }
 0x4b3   : > { %p1079_p4 = scmp.ne.s32.totalorder %s1338_s28, %s1078_s6  ;;  %p1083_p9 = scmp.lt.u32.totalorder %s1338_s28, %s1383_s3 }
 0x4b4   : > { %p1084_p10 = scmp.lt.u32.totalorder %s1082_s9, %s1078_s6  ;;  %p1086_p12 = scmp.lt.u32.totalorder %s1078_s6, %s1338_s28 }
 0x4b5   : > { %p1080_p7 = pnand %p1079_p4, %p1189_p5 }
 0x4b6   : > { %p1085_p11 = por %p1084_p10, %p1083_p9 }
 0x4b7   : > { %p1081_p8 = pneg %p1080_p7 }
 0x4b8   : > { %p1087_p13 = por %p1086_p12, %p1085_p11 }
 0x4ba   : > { %p1088_p0 = pnand %p1087_p13, %p1081_p8 }
 0x4bc   : > { %1091 = shalt.err (!%p1088_p0)
}
 0x4bd   : > { %1021 = dma.vmem_to_hbm [thread:$0]  (%p1189_p5), %s1340_s25, 64, %s1338_s28, %s793_s29  }
 0x4be PF: > { %p1027_p1 = scmp.ge.s32.totalorder %s1126_s15, 2  ;;  %s819_s17 = sand.u32 1, %s1114_s12  }
 0x4bf   : > { %s820_s19 = scalar_lea.sflag [#allocation3], %s819_s17 }
 0x4c0   : > { %p1024_p2 = pnand %p1027_p1, %p1193_p6 }
 0x4c2   : > { %1109 = dma.done.wait (!%p1024_p2), %s820_s19, 64  }
 0x4c3   : > { %1111 = vsyncadd (!%p1024_p2), %s820_s19, 4294967232  ;;  %p13_p3 = scmp.ge.s32.totalorder %s1176_s18, 6   ;;  %s1388_s12 = smov %s1118_s13 }
 0x4c4   : > { %s1389_s13 = smov %s1122_s14  ;;  %s1390_s14 = smov %s1187_s21 }
 0x4c5   : > { %s1391_s15 = smov %s1176_s18  ;;  %15 = sbr.rel (!%p13_p3) target bundleno = 3 (0x3), region = 75 }
 0x4cc   :  { %825 = vsyncpa [#allocation3], 1 }
 0x4cd   :  { %827 = vsyncpa [#allocation3 + $0x1], 1 }

</bundles_post_ra>
